<compile_context>
chip_gen: v5e
topology: v5e:2x2
jax: 0.10.0
libtpu: 0.0.40
codegen_flags: <defaults>
</compile_context>

<pallas_src>
import math

import jax
import jax.numpy as jnp
from jax.experimental import pallas as pl
from jax.experimental.pallas import tpu as pltpu

_LANE = 128
# Below this many bytes the metadata-only reshape is strictly faster than any
# pallas_call (fixed launch + DMA latency), on every TPU generation.
_MIN_KERNEL_BYTES = 1 << 20

_KERNEL_DTYPES = frozenset(
    jnp.dtype(t) for t in
    (jnp.float32, jnp.bfloat16, jnp.int32, jnp.uint32, jnp.int8, jnp.uint8)
)


def _copy_kernel(x_ref, o_ref):
    # Identity data movement: one (tile_rows, 128) lane-dense block per step.
    # The vst slot has huge slack vs. the DMA, so the body is never the
    # bottleneck; all tuning lives in the grid/block shaping below.
    o_ref[...] = x_ref[...]


def _device_block_config():
    """(block_bytes, vmem_limit_bytes_or_None) tuned per TPU generation."""
    try:
        kind = jax.devices()[0].device_kind.lower()
    except Exception:  # pragma: no cover - defensive
        kind = ""
    if "v7" in kind or "tpu7" in kind:
        # ~3.2 TB/s HBM: 8 MiB blocks amortize the ~0.35us/step overhead.
        # Double-buffered in+out = 32 MiB, above the 32 MiB default scoped
        # limit, so raise it explicitly (64 MiB physical VMEM).
        return 8 << 20, 40 << 20
    if "v6" in kind:
        # 4 MiB blocks -> 16 MiB double-buffered, fits the 32 MiB default.
        return 4 << 20, None
    # v5e / unknown: 2 MiB blocks -> 8 MiB, fits the 16 MiB default limit.
    return 2 << 20, None


def _round_down(x, m):
    return (x // m) * m


def _round_up(x, m):
    return ((x + m - 1) // m) * m


def _choose_row_tile(rows, itemsize, block_bytes):
    """Pick a sublane-aligned row tile giving >=2 (ideally ~4) grid steps."""
    sub = max(8, 32 // itemsize)  # sublane pack: 8 f32, 16 bf16, 32 int8
    tr = max(_round_down(block_bytes // (_LANE * itemsize), sub), sub)
    if rows <= 2 * tr:
        # Fewer than ~2 steps: shrink toward rows/4 so v7x's two TensorCores
        # both get work under dimension_semantics=("parallel",).
        quarter = _round_up((rows + 3) // 4, sub)
        tr = max(min(tr, quarter), sub)
    if tr >= rows:
        return rows  # full-extent single block (always layout-legal)
    return tr        # multiple of `sub`; partial last block handled by Pallas


def _pallas_identity_copy(flat, block_bytes=None):
    """Copy a 1-D buffer through a lane-dense (rows, 128) Pallas kernel."""
    itemsize = jnp.dtype(flat.dtype).itemsize
    rows = flat.shape[0] // _LANE
    x2d = flat.reshape(rows, _LANE)  # metadata-only

    dev_block, vmem_limit = _device_block_config()
    if block_bytes is None:
        block_bytes = dev_block
    tr = _choose_row_tile(rows, itemsize, block_bytes)
    grid = (pl.cdiv(rows, tr),)

    cp_kwargs = {}
    if vmem_limit is not None:
        cp_kwargs["vmem_limit_bytes"] = vmem_limit

    out = pl.pallas_call(
        _copy_kernel,
        out_shape=jax.ShapeDtypeStruct((rows, _LANE), x2d.dtype),
        grid_spec=pltpu.PrefetchScalarGridSpec(
            num_scalar_prefetch=0,
            grid=grid,
            in_specs=[pl.BlockSpec((tr, _LANE), lambda i: (i, 0))],
            out_specs=pl.BlockSpec((tr, _LANE), lambda i: (i, 0)),
        ),
        compiler_params=pltpu.CompilerParams(
            dimension_semantics=("parallel",), **cp_kwargs),
        cost_estimate=pl.CostEstimate(
            flops=0, transcendentals=0,
            bytes_accessed=2 * rows * _LANE * itemsize),
    )(x2d)
    return out.reshape(-1)  # metadata-only


def reshape_forward(x, shape, *, min_kernel_bytes=_MIN_KERNEL_BYTES,
                    block_bytes=None):
    """Equivalent of Reshape(*shape).forward(x).

    Small / ragged / wide-dtype inputs return the metadata-only reshape (the
    exact and fastest answer).  Large lane-dense buffers run the tuned Pallas
    identity-copy kernel in their native dtype.
    """
    total = math.prod(x.shape)
    shape = tuple(int(d) for d in shape)
    if -1 in shape:
        known = math.prod(d for d in shape if d != -1)
        shape = tuple((total // known if known else 0) if d == -1 else d
                      for d in shape)
    assert math.prod(shape) == total, "invalid reshape target"

    itemsize = jnp.dtype(x.dtype).itemsize
    nbytes = total * itemsize
    if (total == 0
            or nbytes < min_kernel_bytes
            or total % _LANE != 0
            or jnp.dtype(x.dtype) not in _KERNEL_DTYPES):
        # Metadata-only reshape.
        # TODO(synk): >=64-bit dtypes and non-lane-divisible totals stay on
        # the metadata-only path (a masked/padded kernel would only add cost).
        return x.reshape(shape)

    y_flat = _pallas_identity_copy(x.reshape(-1), block_bytes=block_bytes)
    return y_flat.reshape(shape)


if __name__ == "__main__":
    key = jax.random.PRNGKey(0)

    # 1) NCHW conv-feature-map style input, Reshape(2, -1): the common repo
    #    use.  Small -> metadata-only fast path (per perf review).
    x = jax.random.normal(key, (2, 4, 16, 16), dtype=jnp.float32)
    y = jax.block_until_ready(reshape_forward(x, (2, -1)))
    expected = x.reshape(2, -1)
    assert y.shape == expected.shape and y.dtype == expected.dtype
    assert bool(jnp.array_equal(y, expected))

    # 2) Pallas path: ~1.8 MiB f32 buffer, block_bytes override to force a
    #    deterministic multi-step grid (>=2 TC-shardable steps) with a
    #    partial last block.
    x2 = jax.random.normal(key, (36, 100, 128), dtype=jnp.float32)
    y2 = jax.block_until_ready(
        reshape_forward(x2, (-1, 128), block_bytes=512 * 1024))
    assert bool(jnp.array_equal(y2, x2.reshape(-1, 128)))

    # 3) bf16 input through the kernel in its NATIVE dtype (no bitcast
    #    packing); forced past the size threshold to exercise that path.
    x3 = jax.random.normal(key, (2, 8, 32), dtype=jnp.bfloat16)
    y3 = jax.block_until_ready(
        reshape_forward(x3, (-1, 32), min_kernel_bytes=0))
    assert y3.dtype == jnp.bfloat16
    assert bool(jnp.array_equal(y3, x3.reshape(-1, 32)))

    # 4) Ragged total -> metadata-only fallback (no kernel).
    x4 = jax.random.normal(key, (3, 5, 7), dtype=jnp.float32)
    y4 = jax.block_until_ready(reshape_forward(x4, (5, 21)))
    assert bool(jnp.array_equal(y4, x4.reshape(5, 21)))

    print("KERNEL_OK")
</pallas_src>

<mosaic_0001>
module attributes {stable_mosaic.version = 11 : i64} {
  func.func @_copy_kernel(%arg0: i32, %arg1: memref<1024x128xf32, #tpu.memory_space<vmem>>, %arg2: memref<1024x128xf32, #tpu.memory_space<vmem>>) attributes {dimension_semantics = [#tpu.dimension_semantics<parallel>], iteration_bounds = array<i64: 4>, scalar_prefetch = 0 : i64, scratch_operands = 0 : i64, tpu.core_type = #tpu.core_type<tc>, window_params = [{transform_indices = @transform_0, window_bounds = array<i64: 1024, 128>}, {transform_indices = @transform_1, window_bounds = array<i64: 1024, 128>}]} {
    %c0 = arith.constant 0 : index
    %c0_0 = arith.constant 0 : index
    %0 = vector.load %arg1[%c0, %c0_0] : memref<1024x128xf32, #tpu.memory_space<vmem>>, vector<1024x128xf32>
    %c0_1 = arith.constant 0 : index
    %c0_2 = arith.constant 0 : index
    %1 = vector.load %arg2[%c0_1, %c0_2] : memref<1024x128xf32, #tpu.memory_space<vmem>>, vector<1024x128xf32>
    tpu.vector_store %arg2[%c0_1, %c0_2], %0 {strides = array<i32>} : memref<1024x128xf32, #tpu.memory_space<vmem>>, vector<1024x128xf32>,
    return
  }
  func.func @transform_0(%arg0: i32) -> (i32, i32) {
    %c0_i32 = arith.constant 0 : i32
    %c0_i32_0 = arith.constant 0 : i32
    return %arg0, %c0_i32 : i32, i32
  }
  func.func @transform_1(%arg0: i32) -> (i32, i32) {
    %c0_i32 = arith.constant 0 : i32
    %c0_i32_0 = arith.constant 0 : i32
    return %arg0, %c0_i32 : i32, i32
  }
}

</mosaic_0001>

<bundles_post_ra>
// kernel: tpu_custom_call.1
= control target key start
LH: loop header
LB: loop body
LE: loop exit
PB: predicated region body
PF: predicated region fallthrough
CT: control target
= control target key end

     0   :  { %6 = vsyncpa [#allocation3], 0  ;;  %s1138_s0 = inlined_call_operand.hbm [shape: f32[3600,128], index: 0, kind: input, shape index: {}]   ;;  %s1139_s1 = inlined_call_operand.hbm [shape: f32[3600,128], index: 1, kind: output, shape index: {}]  }
   0x1   :  { %8 = vsyncpa [#allocation3 + $0x1], 0 }
   0x2   :  { %9 = vsyncpa [#allocation4], 0 }
   0x3   :  { %11 = vsyncpa [#allocation4 + $0x1], 0  ;;  %s707_s6 = smov 0   ;;  %s709_s7 = smov 0  }
   0x4   :  { %s711_s8 = smov 0   ;;  %s713_s9 = smov 0  }
   0x5 LB: > { %s728_s10 = sadd.s32 4294967295, %s689_s9   ;;  %s506_s11 = sadd.s32 4294967294, %s689_s9   ;;  %s689_s9 = sphi %s713_s9, %s1148_s9   ;;  %s685_s8 = sphi %s711_s8, %s1147_s8   ;;  %s681_s7 = sphi %s709_s7, %s1146_s7   ;;  %s677_s6 = sphi %s707_s6, %s1145_s6  }
   0x6   : > { %s732_s12 = sadd.s32 1, %s689_s9   ;;  %s24_s13 = sadd.s32 1, %s685_s8 }
   0x7   : > { %s21_s14 = ssub.s32 %s689_s9, %s732_s12  ;;  %p31_p0 = scmp.ne.s32.totalorder %s685_s8, %s681_s7 }
   0x8   : > { %p22_p1 = scmp.eq.s32.totalorder %s21_s14, 0  ;;  %p32_p2 = scmp.eq.s32.totalorder %s689_s9, 0 }
   0x9   : > { %p37_p3 = scmp.ne.s32.totalorder %s681_s7, %s677_s6  ;;  %p38_p4 = scmp.eq.s32.totalorder %s728_s10, 0 }
   0xa   : > { %s744_s15 = scalar_select %p22_p1, %s685_s8, %s24_s13  }
   0xb   : > { %p33_p5 = por %p32_p2, %p31_p0  ;;  %p746_p6 = por %p38_p4, %p37_p3 }
   0xc   : > { %p61_p7 = scmp.eq.s32.totalorder %s728_s10, 3  ;;  %p67_p8 = scmp.eq.s32.totalorder %s506_s11, 3 }
   0xd   : > { %p508_p11 = scmp.ge.s32.totalorder %s689_s9, 4 }
   0xe   : > { %p751_p9 = por %p61_p7, %p31_p0  ;;  %p755_p10 = por %p67_p8, %p37_p3 }
   0xf   : > { %83 = sbr.rel (%p508_p11) target bundleno = 56 (0x38), region = 16 }
  0x14   : > { %86 = sbr.rel (!%p33_p5) target bundleno = 56 (0x38), region = 20  ;;  %s87_s19 = sand.u32 (%p33_p5), 1, %s685_s8  }
  0x15   : > { %s510_s20 = sshll.u32 (%p33_p5), %s689_s9, 7  ;;  %s509_s21 = sshll.u32 (%p33_p5), %s87_s19, 10 }
  0x16   : > { %s93_s22 = ssub.s32 (%p33_p5), 450, %s510_s20  ;;  %s765_s26 = scalar_lea.sflag (%p33_p5), [#allocation3], %s87_s19 }
  0x17   : > { %p94_p12 = scmp.lt.s32.totalorder (%p33_p5), %s93_s22, 128  ;;  %s91_s27 = scalar_lea.vmem (%p33_p5), [#allocation2], %s509_s21 }
  0x19   : > { %s1150_s22 = smov (!%p94_p12, %s93_s22), 128 }
  0x1a   : > { %s511_s23 = sshll.u32 %s1150_s22, 3 }
  0x1b   : > { %s97_s24 = ssub.s32 1024, %s511_s23 }
  0x1c   : > { %s98_s25 = sshll.u32 %s97_s24, 4 }
  0x1d   : > { %99 = vsyncadd %s765_s26, %s98_s25  ;;  %p768_p13 = scmp.ne.s32.totalorder %s511_s23, 0  ;;  %s528_s29 = sshll.u32 %s689_s9, 10 }
  0x1e   : > { %s102_s3 = scalar_lea.hbm %s1138_s0, %s528_s29  ;;  %s776_s4 = sshll.u32 %s91_s27, 4  ;;  %s107_s4 = int_to_ptr.vmem [resolvable:$true] %s776_s4 }
  0x1f   : > { %s104_s5 = sshll.u32 %s102_s3, 4  ;;  %s515_s11 = sshll.u32 %s1150_s22, 7  ;;  %s779_s5 = int_to_ptr.hbm [resolvable:$true] %s104_s5 }
  0x20   : > { %s573_s13 = sshra.s32 %s779_s5, 4  ;;  %s575_s14 = sshrl.u32 %s515_s11, 4  ;;  %s574_s13 = int_to_ptr.hbm [resolvable:$true] %s573_s13 }
  0x21   : > { %s580_s19 = scalar_lea.hbm %s574_s13, %s575_s14  ;;  %s584_s23 = scalar_lea.hbm %s1138_s0, 3600 }
  0x22   : > { %p581_p0 = scmp.ne.s32.totalorder %s574_s13, %s580_s19  ;;  %p585_p3 = scmp.lt.s32.totalorder %s574_s13, %s1138_s0 }
  0x23   : > { %p586_p4 = scmp.lt.s32.totalorder %s584_s23, %s580_s19 }
  0x24   : > { %p582_p1 = pnand %p581_p0, %p768_p13 }
  0x25   : > { %p587_p5 = por %p586_p4, %p585_p3 }
  0x26   : > { %p583_p2 = pneg %p582_p1 }
  0x28   : > { %p588_p7 = pnand %p587_p5, %p583_p2 }
  0x2a   : > { %591 = shalt.err (!%p588_p7)
}
  0x2b   : > { %s592_s27 = sshra.s32 %s107_s4, 4  ;;  %s691_s30 = smov [#allocation2]   ;;  %s593_s27 = int_to_ptr.vmem [resolvable:$true] %s592_s27 }
  0x2c   : > { %s599_s29 = scalar_lea.vmem %s593_s27, %s575_s14  ;;  %s603_s2 = scalar_lea.vmem %s691_s30, 2048 }
  0x2d   : > { %p600_p8 = scmp.ne.s32.totalorder %s593_s27, %s599_s29  ;;  %p605_p0 = scmp.lt.s32.totalorder %s603_s2, %s599_s29 }
  0x2f   : > { %p601_p11 = pnand %p600_p8, %p768_p13 }
  0x31   : > { %p602_p12 = pneg %p601_p11 }
  0x33   : > { %p607_p1 = pnand %p605_p0, %p602_p12 }
  0x35   : > { %610 = shalt.err (!%p607_p1)
}
  0x36   : > { %s692_s3 = smov 128   ;;  %s693_s13 = smov 8  }
  0x37   : > { %112 = dma.hbm_to_vmem [thread:$0]  (%p768_p13), %s779_s5, %s515_s11, %s107_s4, %s765_s26, %s692_s3, %s692_s3, %s693_s13  }
  0x38 PF: > { %p516_p2 = scmp.ge.s32.totalorder %s689_s9, 1  ;;  %p114_p3 = scmp.lt.s32.totalorder %s689_s9, 5 }
  0x3a   : > { %p115_p4 = pnand %p516_p2, %p114_p3 }
  0x3b   : > { %s808_s14 = sand.u32 (!%p115_p4), 1, %s681_s7  }
  0x3c   : > { %118 = sbr.rel (%p115_p4) target bundleno = 226 (0xe2), region = 24  ;;  %s517_s19 = sshll.u32 (!%p115_p4), %s808_s14, 10 }
  0x3d   : > { %s121_s20 = scalar_lea.sflag (!%p115_p4), [#allocation3], %s808_s14  ;;  %s812_s28 = scalar_lea.vmem (!%p115_p4), [#allocation2], %s517_s19 }
  0x41   : > { %668 = dma.done.wait (%p746_p6), %s121_s20, 16384  }
  0x42   : > { %670 = vsyncadd (%p746_p6), %s121_s20, 4294950912  ;;  %v154_v0 = vld [vmem:[%s812_s28] sm:$0xff]  ;;  %v155_v1 = vld [vmem:[%s812_s28 + $0x8] sm:$0xff]  ;;  %s821_s22 = scalar_lea.vmem [#allocation5], %s517_s19  ;;  %s411_s16 = scalar_lea.sflag [#allocation4], %s808_s14 }
  0x43   : > { %v156_v2 = vld [vmem:[%s812_s28 + $0x10] sm:$0xff]  ;;  %282 = vst [vmem:[%s821_s22] sm:$0xff] %v154_v0  ;;  %v157_v3 = vld [vmem:[%s812_s28 + $0x18] sm:$0xff]  ;;  %v158_v4 = vld [vmem:[%s812_s28 + $0x20] sm:$0xff]  ;;  %s520_s26 = sshll.u32 (%p751_p9), %s728_s10, 7 }
  0x44   : > { %283 = vst [vmem:[%s821_s22 + $0x8] sm:$0xff] %v155_v1  ;;  %v159_v5 = vld [vmem:[%s812_s28 + $0x28] sm:$0xff]  ;;  %v160_v6 = vld [vmem:[%s812_s28 + $0x30] sm:$0xff]  ;;  %v161_v7 = vld [vmem:[%s812_s28 + $0x38] sm:$0xff]  ;;  %s419_s4 = ssub.s32 (%p751_p9), 450, %s520_s26 }
  0x45   : > { %284 = vst [vmem:[%s821_s22 + $0x10] sm:$0xff] %v156_v2  ;;  %v162_v8 = vld [vmem:[%s812_s28 + $0x40] sm:$0xff]  ;;  %v163_v9 = vld [vmem:[%s812_s28 + $0x48] sm:$0xff]  ;;  %v164_v10 = vld [vmem:[%s812_s28 + $0x50] sm:$0xff]  ;;  %p420_p6 = scmp.lt.s32.totalorder (%p751_p9), %s419_s4, 128 }
  0x46   : > { %285 = vst [vmem:[%s821_s22 + $0x18] sm:$0xff] %v157_v3  ;;  %v165_v11 = vld [vmem:[%s812_s28 + $0x58] sm:$0xff]  ;;  %v166_v12 = vld [vmem:[%s812_s28 + $0x60] sm:$0xff]  ;;  %v167_v13 = vld [vmem:[%s812_s28 + $0x68] sm:$0xff] }
  0x47   : > { %286 = vst [vmem:[%s821_s22 + $0x20] sm:$0xff] %v158_v4  ;;  %v168_v14 = vld [vmem:[%s812_s28 + $0x70] sm:$0xff]  ;;  %v169_v15 = vld [vmem:[%s812_s28 + $0x78] sm:$0xff]  ;;  %v170_v16 = vld [vmem:[%s812_s28 + $0x80] sm:$0xff] }
  0x48   : > { %287 = vst [vmem:[%s821_s22 + $0x28] sm:$0xff] %v159_v5  ;;  %v171_v17 = vld [vmem:[%s812_s28 + $0x88] sm:$0xff]  ;;  %v172_v18 = vld [vmem:[%s812_s28 + $0x90] sm:$0xff]  ;;  %v173_v19 = vld [vmem:[%s812_s28 + $0x98] sm:$0xff] }
  0x49   : > { %288 = vst [vmem:[%s821_s22 + $0x30] sm:$0xff] %v160_v6  ;;  %v174_v20 = vld [vmem:[%s812_s28 + $0xa0] sm:$0xff]  ;;  %v175_v21 = vld [vmem:[%s812_s28 + $0xa8] sm:$0xff]  ;;  %v176_v22 = vld [vmem:[%s812_s28 + $0xb0] sm:$0xff] }
  0x4a   : > { %289 = vst [vmem:[%s821_s22 + $0x38] sm:$0xff] %v161_v7  ;;  %v177_v23 = vld [vmem:[%s812_s28 + $0xb8] sm:$0xff]  ;;  %v178_v24 = vld [vmem:[%s812_s28 + $0xc0] sm:$0xff]  ;;  %v179_v25 = vld [vmem:[%s812_s28 + $0xc8] sm:$0xff] }
  0x4b   : > { %290 = vst [vmem:[%s821_s22 + $0x40] sm:$0xff] %v162_v8  ;;  %v180_v26 = vld [vmem:[%s812_s28 + $0xd0] sm:$0xff]  ;;  %v181_v27 = vld [vmem:[%s812_s28 + $0xd8] sm:$0xff]  ;;  %v182_v28 = vld [vmem:[%s812_s28 + $0xe0] sm:$0xff] }
  0x4c   : > { %291 = vst [vmem:[%s821_s22 + $0x48] sm:$0xff] %v163_v9  ;;  %v183_v29 = vld [vmem:[%s812_s28 + $0xe8] sm:$0xff]  ;;  %v184_v30 = vld [vmem:[%s812_s28 + $0xf0] sm:$0xff]  ;;  %v185_v31 = vld [vmem:[%s812_s28 + $0xf8] sm:$0xff] }
  0x4d   : > { %292 = vst [vmem:[%s821_s22 + $0x50] sm:$0xff] %v164_v10  ;;  %v186_v32 = vld [vmem:[%s812_s28 + $0x100] sm:$0xff]  ;;  %v187_v33 = vld [vmem:[%s812_s28 + $0x108] sm:$0xff]  ;;  %v188_v34 = vld [vmem:[%s812_s28 + $0x110] sm:$0xff] }
  0x4e   : > { %293 = vst [vmem:[%s821_s22 + $0x58] sm:$0xff] %v165_v11  ;;  %v189_v35 = vld [vmem:[%s812_s28 + $0x118] sm:$0xff]  ;;  %v190_v36 = vld [vmem:[%s812_s28 + $0x120] sm:$0xff]  ;;  %v191_v37 = vld [vmem:[%s812_s28 + $0x128] sm:$0xff] }
  0x4f   : > { %294 = vst [vmem:[%s821_s22 + $0x60] sm:$0xff] %v166_v12  ;;  %v192_v38 = vld [vmem:[%s812_s28 + $0x130] sm:$0xff]  ;;  %v193_v39 = vld [vmem:[%s812_s28 + $0x138] sm:$0xff]  ;;  %v194_v40 = vld [vmem:[%s812_s28 + $0x140] sm:$0xff] }
  0x50   : > { %295 = vst [vmem:[%s821_s22 + $0x68] sm:$0xff] %v167_v13  ;;  %v195_v41 = vld [vmem:[%s812_s28 + $0x148] sm:$0xff]  ;;  %v196_v42 = vld [vmem:[%s812_s28 + $0x150] sm:$0xff]  ;;  %v197_v43 = vld [vmem:[%s812_s28 + $0x158] sm:$0xff] }
  0x51   : > { %296 = vst [vmem:[%s821_s22 + $0x70] sm:$0xff] %v168_v14  ;;  %v198_v44 = vld [vmem:[%s812_s28 + $0x160] sm:$0xff]  ;;  %v199_v45 = vld [vmem:[%s812_s28 + $0x168] sm:$0xff]  ;;  %v200_v46 = vld [vmem:[%s812_s28 + $0x170] sm:$0xff] }
  0x52   : > { %297 = vst [vmem:[%s821_s22 + $0x78] sm:$0xff] %v169_v15  ;;  %v201_v47 = vld [vmem:[%s812_s28 + $0x178] sm:$0xff]  ;;  %v202_v48 = vld [vmem:[%s812_s28 + $0x180] sm:$0xff]  ;;  %v203_v49 = vld [vmem:[%s812_s28 + $0x188] sm:$0xff] }
  0x53   : > { %298 = vst [vmem:[%s821_s22 + $0x80] sm:$0xff] %v170_v16  ;;  %v204_v50 = vld [vmem:[%s812_s28 + $0x190] sm:$0xff]  ;;  %v205_v51 = vld [vmem:[%s812_s28 + $0x198] sm:$0xff]  ;;  %v206_v52 = vld [vmem:[%s812_s28 + $0x1a0] sm:$0xff] }
  0x54   : > { %299 = vst [vmem:[%s821_s22 + $0x88] sm:$0xff] %v171_v17  ;;  %v207_v53 = vld [vmem:[%s812_s28 + $0x1a8] sm:$0xff]  ;;  %v208_v54 = vld [vmem:[%s812_s28 + $0x1b0] sm:$0xff]  ;;  %v209_v55 = vld [vmem:[%s812_s28 + $0x1b8] sm:$0xff] }
  0x55   : > { %300 = vst [vmem:[%s821_s22 + $0x90] sm:$0xff] %v172_v18  ;;  %v210_v56 = vld [vmem:[%s812_s28 + $0x1c0] sm:$0xff]  ;;  %v211_v57 = vld [vmem:[%s812_s28 + $0x1c8] sm:$0xff]  ;;  %v212_v58 = vld [vmem:[%s812_s28 + $0x1d0] sm:$0xff] }
  0x56   : > { %301 = vst [vmem:[%s821_s22 + $0x98] sm:$0xff] %v173_v19  ;;  %v213_v59 = vld [vmem:[%s812_s28 + $0x1d8] sm:$0xff]  ;;  %v214_v60 = vld [vmem:[%s812_s28 + $0x1e0] sm:$0xff]  ;;  %v215_v61 = vld [vmem:[%s812_s28 + $0x1e8] sm:$0xff] }
  0x57   : > { %302 = vst [vmem:[%s821_s22 + $0xa0] sm:$0xff] %v174_v20  ;;  %v216_v62 = vld [vmem:[%s812_s28 + $0x1f0] sm:$0xff]  ;;  %v217_v63 = vld [vmem:[%s812_s28 + $0x1f8] sm:$0xff]  ;;  %v218_v0 = vld [vmem:[%s812_s28 + $0x200] sm:$0xff] }
  0x58   : > { %303 = vst [vmem:[%s821_s22 + $0xa8] sm:$0xff] %v175_v21  ;;  %v219_v1 = vld [vmem:[%s812_s28 + $0x208] sm:$0xff]  ;;  %v220_v2 = vld [vmem:[%s812_s28 + $0x210] sm:$0xff]  ;;  %v221_v3 = vld [vmem:[%s812_s28 + $0x218] sm:$0xff] }
  0x59   : > { %304 = vst [vmem:[%s821_s22 + $0xb0] sm:$0xff] %v176_v22  ;;  %v222_v4 = vld [vmem:[%s812_s28 + $0x220] sm:$0xff]  ;;  %v223_v5 = vld [vmem:[%s812_s28 + $0x228] sm:$0xff]  ;;  %v224_v6 = vld [vmem:[%s812_s28 + $0x230] sm:$0xff] }
  0x5a   : > { %305 = vst [vmem:[%s821_s22 + $0xb8] sm:$0xff] %v177_v23  ;;  %v225_v7 = vld [vmem:[%s812_s28 + $0x238] sm:$0xff]  ;;  %v226_v8 = vld [vmem:[%s812_s28 + $0x240] sm:$0xff]  ;;  %v227_v9 = vld [vmem:[%s812_s28 + $0x248] sm:$0xff] }
  0x5b   : > { %306 = vst [vmem:[%s821_s22 + $0xc0] sm:$0xff] %v178_v24  ;;  %v228_v10 = vld [vmem:[%s812_s28 + $0x250] sm:$0xff]  ;;  %v229_v11 = vld [vmem:[%s812_s28 + $0x258] sm:$0xff]  ;;  %v230_v12 = vld [vmem:[%s812_s28 + $0x260] sm:$0xff] }
  0x5c   : > { %307 = vst [vmem:[%s821_s22 + $0xc8] sm:$0xff] %v179_v25  ;;  %v231_v13 = vld [vmem:[%s812_s28 + $0x268] sm:$0xff]  ;;  %v232_v14 = vld [vmem:[%s812_s28 + $0x270] sm:$0xff]  ;;  %v233_v15 = vld [vmem:[%s812_s28 + $0x278] sm:$0xff] }
  0x5d   : > { %308 = vst [vmem:[%s821_s22 + $0xd0] sm:$0xff] %v180_v26  ;;  %v234_v16 = vld [vmem:[%s812_s28 + $0x280] sm:$0xff]  ;;  %v235_v17 = vld [vmem:[%s812_s28 + $0x288] sm:$0xff]  ;;  %v236_v18 = vld [vmem:[%s812_s28 + $0x290] sm:$0xff] }
  0x5e   : > { %309 = vst [vmem:[%s821_s22 + $0xd8] sm:$0xff] %v181_v27  ;;  %v237_v19 = vld [vmem:[%s812_s28 + $0x298] sm:$0xff]  ;;  %v238_v20 = vld [vmem:[%s812_s28 + $0x2a0] sm:$0xff]  ;;  %v239_v21 = vld [vmem:[%s812_s28 + $0x2a8] sm:$0xff] }
  0x5f   : > { %310 = vst [vmem:[%s821_s22 + $0xe0] sm:$0xff] %v182_v28  ;;  %v240_v22 = vld [vmem:[%s812_s28 + $0x2b0] sm:$0xff]  ;;  %v241_v23 = vld [vmem:[%s812_s28 + $0x2b8] sm:$0xff]  ;;  %v242_v24 = vld [vmem:[%s812_s28 + $0x2c0] sm:$0xff] }
  0x60   : > { %311 = vst [vmem:[%s821_s22 + $0xe8] sm:$0xff] %v183_v29  ;;  %v243_v25 = vld [vmem:[%s812_s28 + $0x2c8] sm:$0xff]  ;;  %v244_v26 = vld [vmem:[%s812_s28 + $0x2d0] sm:$0xff]  ;;  %v245_v27 = vld [vmem:[%s812_s28 + $0x2d8] sm:$0xff] }
  0x61   : > { %312 = vst [vmem:[%s821_s22 + $0xf0] sm:$0xff] %v184_v30  ;;  %v246_v28 = vld [vmem:[%s812_s28 + $0x2e0] sm:$0xff]  ;;  %v247_v29 = vld [vmem:[%s812_s28 + $0x2e8] sm:$0xff]  ;;  %v248_v30 = vld [vmem:[%s812_s28 + $0x2f0] sm:$0xff] }
  0x62   : > { %313 = vst [vmem:[%s821_s22 + $0xf8] sm:$0xff] %v185_v31  ;;  %v249_v31 = vld [vmem:[%s812_s28 + $0x2f8] sm:$0xff] }
  0x63   : > { %314 = vst [vmem:[%s821_s22 + $0x100] sm:$0xff] %v186_v32  ;;  %v250_v32 = vld [vmem:[%s812_s28 + $0x300] sm:$0xff] }
  0x64   : > { %315 = vst [vmem:[%s821_s22 + $0x108] sm:$0xff] %v187_v33  ;;  %v251_v33 = vld [vmem:[%s812_s28 + $0x308] sm:$0xff] }
  0x65   : > { %316 = vst [vmem:[%s821_s22 + $0x110] sm:$0xff] %v188_v34  ;;  %v252_v34 = vld [vmem:[%s812_s28 + $0x310] sm:$0xff] }
  0x66   : > { %317 = vst [vmem:[%s821_s22 + $0x118] sm:$0xff] %v189_v35  ;;  %v253_v35 = vld [vmem:[%s812_s28 + $0x318] sm:$0xff] }
  0x67   : > { %318 = vst [vmem:[%s821_s22 + $0x120] sm:$0xff] %v190_v36  ;;  %v254_v36 = vld [vmem:[%s812_s28 + $0x320] sm:$0xff] }
  0x68   : > { %319 = vst [vmem:[%s821_s22 + $0x128] sm:$0xff] %v191_v37  ;;  %v255_v37 = vld [vmem:[%s812_s28 + $0x328] sm:$0xff] }
  0x69   : > { %320 = vst [vmem:[%s821_s22 + $0x130] sm:$0xff] %v192_v38  ;;  %v256_v38 = vld [vmem:[%s812_s28 + $0x330] sm:$0xff] }
  0x6a   : > { %321 = vst [vmem:[%s821_s22 + $0x138] sm:$0xff] %v193_v39  ;;  %v257_v39 = vld [vmem:[%s812_s28 + $0x338] sm:$0xff] }
  0x6b   : > { %322 = vst [vmem:[%s821_s22 + $0x140] sm:$0xff] %v194_v40  ;;  %v258_v40 = vld [vmem:[%s812_s28 + $0x340] sm:$0xff] }
  0x6c   : > { %323 = vst [vmem:[%s821_s22 + $0x148] sm:$0xff] %v195_v41  ;;  %v259_v41 = vld [vmem:[%s812_s28 + $0x348] sm:$0xff] }
  0x6d   : > { %324 = vst [vmem:[%s821_s22 + $0x150] sm:$0xff] %v196_v42  ;;  %v260_v42 = vld [vmem:[%s812_s28 + $0x350] sm:$0xff] }
  0x6e   : > { %325 = vst [vmem:[%s821_s22 + $0x158] sm:$0xff] %v197_v43  ;;  %v261_v43 = vld [vmem:[%s812_s28 + $0x358] sm:$0xff] }
  0x6f   : > { %326 = vst [vmem:[%s821_s22 + $0x160] sm:$0xff] %v198_v44  ;;  %v262_v44 = vld [vmem:[%s812_s28 + $0x360] sm:$0xff] }
  0x70   : > { %327 = vst [vmem:[%s821_s22 + $0x168] sm:$0xff] %v199_v45  ;;  %v263_v45 = vld [vmem:[%s812_s28 + $0x368] sm:$0xff] }
  0x71   : > { %328 = vst [vmem:[%s821_s22 + $0x170] sm:$0xff] %v200_v46  ;;  %v264_v46 = vld [vmem:[%s812_s28 + $0x370] sm:$0xff] }
  0x72   : > { %329 = vst [vmem:[%s821_s22 + $0x178] sm:$0xff] %v201_v47  ;;  %v265_v47 = vld [vmem:[%s812_s28 + $0x378] sm:$0xff] }
  0x73   : > { %330 = vst [vmem:[%s821_s22 + $0x180] sm:$0xff] %v202_v48  ;;  %v266_v48 = vld [vmem:[%s812_s28 + $0x380] sm:$0xff] }
  0x74   : > { %331 = vst [vmem:[%s821_s22 + $0x188] sm:$0xff] %v203_v49  ;;  %v267_v49 = vld [vmem:[%s812_s28 + $0x388] sm:$0xff] }
  0x75   : > { %332 = vst [vmem:[%s821_s22 + $0x190] sm:$0xff] %v204_v50  ;;  %v268_v50 = vld [vmem:[%s812_s28 + $0x390] sm:$0xff] }
  0x76   : > { %333 = vst [vmem:[%s821_s22 + $0x198] sm:$0xff] %v205_v51  ;;  %v269_v51 = vld [vmem:[%s812_s28 + $0x398] sm:$0xff] }
  0x77   : > { %334 = vst [vmem:[%s821_s22 + $0x1a0] sm:$0xff] %v206_v52  ;;  %v270_v52 = vld [vmem:[%s812_s28 + $0x3a0] sm:$0xff] }
  0x78   : > { %335 = vst [vmem:[%s821_s22 + $0x1a8] sm:$0xff] %v207_v53  ;;  %v271_v53 = vld [vmem:[%s812_s28 + $0x3a8] sm:$0xff] }
  0x79   : > { %336 = vst [vmem:[%s821_s22 + $0x1b0] sm:$0xff] %v208_v54  ;;  %v272_v54 = vld [vmem:[%s812_s28 + $0x3b0] sm:$0xff] }
  0x7a   : > { %337 = vst [vmem:[%s821_s22 + $0x1b8] sm:$0xff] %v209_v55  ;;  %v273_v55 = vld [vmem:[%s812_s28 + $0x3b8] sm:$0xff] }
  0x7b   : > { %338 = vst [vmem:[%s821_s22 + $0x1c0] sm:$0xff] %v210_v56  ;;  %v274_v56 = vld [vmem:[%s812_s28 + $0x3c0] sm:$0xff] }
  0x7c   : > { %339 = vst [vmem:[%s821_s22 + $0x1c8] sm:$0xff] %v211_v57  ;;  %v275_v57 = vld [vmem:[%s812_s28 + $0x3c8] sm:$0xff] }
  0x7d   : > { %340 = vst [vmem:[%s821_s22 + $0x1d0] sm:$0xff] %v212_v58  ;;  %v276_v58 = vld [vmem:[%s812_s28 + $0x3d0] sm:$0xff] }
  0x7e   : > { %341 = vst [vmem:[%s821_s22 + $0x1d8] sm:$0xff] %v213_v59  ;;  %v277_v59 = vld [vmem:[%s812_s28 + $0x3d8] sm:$0xff] }
  0x7f   : > { %342 = vst [vmem:[%s821_s22 + $0x1e0] sm:$0xff] %v214_v60  ;;  %v278_v60 = vld [vmem:[%s812_s28 + $0x3e0] sm:$0xff] }
  0x80   : > { %343 = vst [vmem:[%s821_s22 + $0x1e8] sm:$0xff] %v215_v61  ;;  %v279_v61 = vld [vmem:[%s812_s28 + $0x3e8] sm:$0xff] }
  0x81   : > { %344 = vst [vmem:[%s821_s22 + $0x1f0] sm:$0xff] %v216_v62  ;;  %v280_v62 = vld [vmem:[%s812_s28 + $0x3f0] sm:$0xff] }
  0x82   : > { %345 = vst [vmem:[%s821_s22 + $0x1f8] sm:$0xff] %v217_v63  ;;  %v281_v63 = vld [vmem:[%s812_s28 + $0x3f8] sm:$0xff] }
  0x83   : > { %346 = vst [vmem:[%s821_s22 + $0x200] sm:$0xff] %v218_v0 }
  0x84   : > { %347 = vst [vmem:[%s821_s22 + $0x208] sm:$0xff] %v219_v1 }
  0x85   : > { %348 = vst [vmem:[%s821_s22 + $0x210] sm:$0xff] %v220_v2 }
  0x86   : > { %349 = vst [vmem:[%s821_s22 + $0x218] sm:$0xff] %v221_v3 }
  0x87   : > { %350 = vst [vmem:[%s821_s22 + $0x220] sm:$0xff] %v222_v4 }
  0x88   : > { %351 = vst [vmem:[%s821_s22 + $0x228] sm:$0xff] %v223_v5 }
  0x89   : > { %352 = vst [vmem:[%s821_s22 + $0x230] sm:$0xff] %v224_v6 }
  0x8a   : > { %353 = vst [vmem:[%s821_s22 + $0x238] sm:$0xff] %v225_v7 }
  0x8b   : > { %354 = vst [vmem:[%s821_s22 + $0x240] sm:$0xff] %v226_v8 }
  0x8c   : > { %355 = vst [vmem:[%s821_s22 + $0x248] sm:$0xff] %v227_v9 }
  0x8d   : > { %356 = vst [vmem:[%s821_s22 + $0x250] sm:$0xff] %v228_v10 }
  0x8e   : > { %357 = vst [vmem:[%s821_s22 + $0x258] sm:$0xff] %v229_v11 }
  0x8f   : > { %358 = vst [vmem:[%s821_s22 + $0x260] sm:$0xff] %v230_v12 }
  0x90   : > { %359 = vst [vmem:[%s821_s22 + $0x268] sm:$0xff] %v231_v13 }
  0x91   : > { %360 = vst [vmem:[%s821_s22 + $0x270] sm:$0xff] %v232_v14 }
  0x92   : > { %361 = vst [vmem:[%s821_s22 + $0x278] sm:$0xff] %v233_v15 }
  0x93   : > { %362 = vst [vmem:[%s821_s22 + $0x280] sm:$0xff] %v234_v16 }
  0x94   : > { %363 = vst [vmem:[%s821_s22 + $0x288] sm:$0xff] %v235_v17 }
  0x95   : > { %364 = vst [vmem:[%s821_s22 + $0x290] sm:$0xff] %v236_v18 }
  0x96   : > { %365 = vst [vmem:[%s821_s22 + $0x298] sm:$0xff] %v237_v19 }
  0x97   : > { %366 = vst [vmem:[%s821_s22 + $0x2a0] sm:$0xff] %v238_v20 }
  0x98   : > { %367 = vst [vmem:[%s821_s22 + $0x2a8] sm:$0xff] %v239_v21 }
  0x99   : > { %368 = vst [vmem:[%s821_s22 + $0x2b0] sm:$0xff] %v240_v22 }
  0x9a   : > { %369 = vst [vmem:[%s821_s22 + $0x2b8] sm:$0xff] %v241_v23 }
  0x9b   : > { %370 = vst [vmem:[%s821_s22 + $0x2c0] sm:$0xff] %v242_v24 }
  0x9c   : > { %371 = vst [vmem:[%s821_s22 + $0x2c8] sm:$0xff] %v243_v25 }
  0x9d   : > { %372 = vst [vmem:[%s821_s22 + $0x2d0] sm:$0xff] %v244_v26 }
  0x9e   : > { %373 = vst [vmem:[%s821_s22 + $0x2d8] sm:$0xff] %v245_v27 }
  0x9f   : > { %374 = vst [vmem:[%s821_s22 + $0x2e0] sm:$0xff] %v246_v28 }
  0xa0   : > { %375 = vst [vmem:[%s821_s22 + $0x2e8] sm:$0xff] %v247_v29 }
  0xa1   : > { %376 = vst [vmem:[%s821_s22 + $0x2f0] sm:$0xff] %v248_v30 }
  0xa2   : > { %377 = vst [vmem:[%s821_s22 + $0x2f8] sm:$0xff] %v249_v31 }
  0xa3   : > { %378 = vst [vmem:[%s821_s22 + $0x300] sm:$0xff] %v250_v32 }
  0xa4   : > { %379 = vst [vmem:[%s821_s22 + $0x308] sm:$0xff] %v251_v33 }
  0xa5   : > { %380 = vst [vmem:[%s821_s22 + $0x310] sm:$0xff] %v252_v34 }
  0xa6   : > { %381 = vst [vmem:[%s821_s22 + $0x318] sm:$0xff] %v253_v35 }
  0xa7   : > { %382 = vst [vmem:[%s821_s22 + $0x320] sm:$0xff] %v254_v36 }
  0xa8   : > { %383 = vst [vmem:[%s821_s22 + $0x328] sm:$0xff] %v255_v37 }
  0xa9   : > { %384 = vst [vmem:[%s821_s22 + $0x330] sm:$0xff] %v256_v38 }
  0xaa   : > { %385 = vst [vmem:[%s821_s22 + $0x338] sm:$0xff] %v257_v39 }
  0xab   : > { %386 = vst [vmem:[%s821_s22 + $0x340] sm:$0xff] %v258_v40 }
  0xac   : > { %387 = vst [vmem:[%s821_s22 + $0x348] sm:$0xff] %v259_v41 }
  0xad   : > { %388 = vst [vmem:[%s821_s22 + $0x350] sm:$0xff] %v260_v42 }
  0xae   : > { %389 = vst [vmem:[%s821_s22 + $0x358] sm:$0xff] %v261_v43 }
  0xaf   : > { %390 = vst [vmem:[%s821_s22 + $0x360] sm:$0xff] %v262_v44 }
  0xb0   : > { %391 = vst [vmem:[%s821_s22 + $0x368] sm:$0xff] %v263_v45 }
  0xb1   : > { %392 = vst [vmem:[%s821_s22 + $0x370] sm:$0xff] %v264_v46 }
  0xb2   : > { %393 = vst [vmem:[%s821_s22 + $0x378] sm:$0xff] %v265_v47 }
  0xb3   : > { %394 = vst [vmem:[%s821_s22 + $0x380] sm:$0xff] %v266_v48 }
  0xb4   : > { %395 = vst [vmem:[%s821_s22 + $0x388] sm:$0xff] %v267_v49 }
  0xb5   : > { %396 = vst [vmem:[%s821_s22 + $0x390] sm:$0xff] %v268_v50 }
  0xb6   : > { %397 = vst [vmem:[%s821_s22 + $0x398] sm:$0xff] %v269_v51 }
  0xb7   : > { %398 = vst [vmem:[%s821_s22 + $0x3a0] sm:$0xff] %v270_v52 }
  0xb8   : > { %399 = vst [vmem:[%s821_s22 + $0x3a8] sm:$0xff] %v271_v53 }
  0xb9   : > { %400 = vst [vmem:[%s821_s22 + $0x3b0] sm:$0xff] %v272_v54 }
  0xba   : > { %401 = vst [vmem:[%s821_s22 + $0x3b8] sm:$0xff] %v273_v55 }
  0xbb   : > { %402 = vst [vmem:[%s821_s22 + $0x3c0] sm:$0xff] %v274_v56 }
  0xbc   : > { %403 = vst [vmem:[%s821_s22 + $0x3c8] sm:$0xff] %v275_v57 }
  0xbd   : > { %404 = vst [vmem:[%s821_s22 + $0x3d0] sm:$0xff] %v276_v58 }
  0xbe   : > { %405 = vst [vmem:[%s821_s22 + $0x3d8] sm:$0xff] %v277_v59  ;;  %417 = sbr.rel (!%p751_p9) target bundleno = 226 (0xe2), region = 32 }
  0xbf   : > { %406 = vst [vmem:[%s821_s22 + $0x3e0] sm:$0xff] %v278_v60 }
  0xc0   : > { %407 = vst [vmem:[%s821_s22 + $0x3e8] sm:$0xff] %v279_v61 }
  0xc1   : > { %408 = vst [vmem:[%s821_s22 + $0x3f0] sm:$0xff] %v280_v62 }
  0xc2   : > { %409 = vst [vmem:[%s821_s22 + $0x3f8] sm:$0xff] %v281_v63 }
  0xc3   : > { %s1152_s4 = smov (!%p420_p6, %s419_s4), 128 }
  0xc4   : > { %s521_s5 = sshll.u32 %s1152_s4, 3 }
  0xc5   : > { %s423_s11 = ssub.s32 1024, %s521_s5 }
  0xc6   : > { %s424_s21 = sshll.u32 %s423_s11, 4 }
  0xc7   : > { %425 = vsyncadd %s411_s16, %s424_s21  ;;  %p1085_p13 = scmp.ne.s32.totalorder %s521_s5, 0  ;;  %s529_s23 = sshll.u32 %s728_s10, 10 }
  0xc8   : > { %s428_s27 = scalar_lea.hbm %s1139_s1, %s529_s23  ;;  %s430_s29 = sshll.u32 %s821_s22, 4  ;;  %s1094_s29 = int_to_ptr.vmem [resolvable:$true] %s430_s29 }
  0xc9   : > { %s432_s30 = sshll.u32 %s428_s27, 4  ;;  %s525_s2 = sshll.u32 %s1152_s4, 7  ;;  %s1096_s30 = int_to_ptr.hbm [resolvable:$true] %s432_s30 }
  0xca   : > { %s612_s3 = sshra.s32 %s1094_s29, 4  ;;  %s614_s13 = sshrl.u32 %s525_s2, 4  ;;  %s613_s3 = int_to_ptr.vmem [resolvable:$true] %s612_s3 }
  0xcb   : > { %s619_s19 = scalar_lea.vmem %s613_s3, %s614_s13  ;;  %s694_s10 = smov [#allocation5]  }
  0xcc   : > { %p620_p9 = scmp.ne.s32.totalorder %s613_s3, %s619_s19  ;;  %s623_s20 = scalar_lea.vmem %s694_s10, 2048 }
  0xcd   : > { %p625_p8 = scmp.lt.s32.totalorder %s623_s20, %s619_s19 }
  0xce   : > { %p621_p5 = pnand %p620_p9, %p1085_p13 }
  0xd0   : > { %p622_p7 = pneg %p621_p5 }
  0xd2   : > { %p627_p11 = pnand %p625_p8, %p622_p7 }
  0xd4   : > { %630 = shalt.err (!%p627_p11)
}
  0xd5   : > { %s631_s28 = sshra.s32 %s1096_s30, 4  ;;  %s642_s11 = scalar_lea.hbm %s1139_s1, 3600  ;;  %s632_s28 = int_to_ptr.hbm [resolvable:$true] %s631_s28 }
  0xd6   : > { %s638_s22 = scalar_lea.hbm %s632_s28, %s614_s13  ;;  %p643_p2 = scmp.lt.s32.totalorder %s632_s28, %s1139_s1 }
  0xd7   : > { %p639_p12 = scmp.ne.s32.totalorder %s632_s28, %s638_s22  ;;  %p644_p3 = scmp.lt.s32.totalorder %s642_s11, %s638_s22 }
  0xd9   : > { %p640_p0 = pnand %p639_p12, %p1085_p13  ;;  %p645_p4 = por %p644_p3, %p643_p2 }
  0xdb   : > { %p641_p1 = pneg %p640_p0 }
  0xdd   : > { %p646_p6 = pnand %p645_p4, %p641_p1 }
  0xdf   : > { %649 = shalt.err (!%p646_p6)
}
  0xe0   : > { %s695_s24 = smov 128   ;;  %s696_s25 = smov 8  }
  0xe1   : > { %438 = dma.vmem_to_hbm [thread:$0]  (%p1085_p13), %s1094_s29, %s525_s2, %s1096_s30, %s411_s16, %s695_s24, %s695_s24, %s696_s25  }
  0xe2 PF: > { %p536_p9 = scmp.ge.s32.totalorder %s689_s9, 2  ;;  %s447_s27 = sand.u32 1, %s677_s6  }
  0xe3   : > { %s448_s3 = scalar_lea.sflag [#allocation4], %s447_s27 }
  0xe4   : > { %p533_p5 = pnand %p536_p9, %p755_p10 }
  0xe6   : > { %p534_p7 = pneg %p533_p5 }
  0xe8   : > { %672 = dma.done.wait (%p534_p7), %s448_s3, 16384  }
  0xe9   : > { %674 = vsyncadd (%p534_p7), %s448_s3, 4294950912  ;;  %p14_p8 = scmp.ge.s32.totalorder %s732_s12, 6   ;;  %s1145_s6 = smov %s681_s7 }
  0xea   : > { %s1146_s7 = smov %s685_s8  ;;  %s1147_s8 = smov %s744_s15 }
  0xeb   : > { %s1148_s9 = smov %s732_s12  ;;  %16 = sbr.rel (!%p14_p8) target bundleno = 5 (0x5), region = 69 }
  0xf0   :  { %454 = vsyncpa [#allocation3], 1 }
  0xf1   :  { %456 = vsyncpa [#allocation3 + $0x1], 1 }
  0xf2   :  { %457 = vsyncpa [#allocation4], 1 }
  0xf3   :  { %459 = vsyncpa [#allocation4 + $0x1], 1 }

</bundles_post_ra>
